<compile_context>
chip_gen: v7x
topology: tpu7x:2x2x1
jax: 0.10.0
libtpu: 0.0.40
codegen_flags: <defaults>
</compile_context>

<pallas_src>
import functools
import math

import jax
import jax.numpy as jnp
import numpy as np
from jax import lax
from jax.experimental import pallas as pl
from jax.experimental.pallas import tpu as pltpu

LANE = 128


def mha_kernel(xq_ref, xk_ref, xv_ref,
               wq_ref, wk_ref, wv_ref, wo_ref,
               bq_ref, bk_ref, bv_ref, bo_ref,
               out_ref, *, num_heads, dim_k, dim_v, use_bf16):
    Bt, Sq, dim_in = xq_ref.shape
    _, Sk, _ = xk_ref.shape
    H = num_heads
    dim_out = wo_ref.shape[-1]                       # lane-padded output width
    mm_dtype = jnp.bfloat16 if use_bf16 else jnp.float32

    # Flatten (batch, seq) -> rows so every projection is ONE fat MXU matmul.
    xq = xq_ref[...].reshape(Bt * Sq, dim_in)
    xk = xk_ref[...].reshape(Bt * Sk, dim_in)
    xv = xv_ref[...].reshape(Bt * Sk, dim_in)

    def mm2d(a, b):
        # 2-D MXU matmul: cast operands only, accumulate in f32.
        return lax.dot_general(a.astype(mm_dtype), b.astype(mm_dtype),
                               (((1,), (0,)), ((), ())),
                               preferred_element_type=jnp.float32)

    # Head-fused projections (softmax scale pre-folded into Wq / bq).
    q_all = (mm2d(xq, wq_ref[...]) + bq_ref[...]).reshape(Bt, Sq, H * dim_k)
    k_all = (mm2d(xk, wk_ref[...]) + bk_ref[...]).reshape(Bt, Sk, H * dim_k)
    v_all = (mm2d(xv, wv_ref[...]) + bv_ref[...]).reshape(Bt, Sk, H * dim_v)

    wo = wo_ref[...]                                  # (H*dim_v, dim_out)
    out = jnp.zeros((Bt * Sq, dim_out), jnp.float32)  # f32 accumulator slab

    for h in range(H):                                # static unroll (H small)
        # TODO(synk): lane-offset slices; free views once dim_k/dim_v % 128 == 0.
        q_h = q_all[:, :, h * dim_k:(h + 1) * dim_k]  # (Bt, Sq, dim_k)
        k_h = k_all[:, :, h * dim_k:(h + 1) * dim_k]  # (Bt, Sk, dim_k)
        v_h = v_all[:, :, h * dim_v:(h + 1) * dim_v]  # (Bt, Sk, dim_v)

        # Scores (already scaled via the folded 1/sqrt(dim_k)).
        s = jnp.einsum("bqd,bkd->bqk", q_h.astype(mm_dtype),
                       k_h.astype(mm_dtype),
                       preferred_element_type=jnp.float32)      # (Bt, Sq, Sk)

        # Numerically-stable softmax, normalization deferred past PV.
        m = jnp.max(s, axis=-1, keepdims=True)
        p = jnp.exp(s - m)
        l = jnp.sum(p, axis=-1, keepdims=True)

        acc = jnp.einsum("bqk,bkd->bqd", p.astype(mm_dtype),
                         v_h.astype(mm_dtype),
                         preferred_element_type=jnp.float32)    # (Bt, Sq, dim_v)
        head = acc * pl.reciprocal(l, approx=True)              # f32

        # concat([heads]) @ Wo  ==  sum_h head_h @ Wo[h*dim_v:(h+1)*dim_v, :]
        # (sublane-aligned row slice of Wo -> no lane concat needed).
        wo_h = wo[h * dim_v:(h + 1) * dim_v, :]
        out = out + mm2d(head.reshape(Bt * Sq, dim_v), wo_h)

    out = out + bo_ref[...]                           # (1, dim_out) broadcast
    out_ref[...] = out.reshape(Bt, Sq, dim_out).astype(out_ref.dtype)


def multi_head_attention(xq, xk, xv, packed, num_heads, dim_k, dim_v,
                         use_bf16=True, batch_block=None):
    """Fused MHA forward.

    use_bf16=True (default, recommended on v5e/v6e/v7x): matmul OPERANDS are
    bf16, accumulation/softmax stay f32 -> expect ~5e-2 agreement with an f32
    reference.  use_bf16=False gives f32-level accuracy everywhere.
    """
    B, Sq, dim_in = xq.shape
    _, Sk, _ = xk.shape
    H = num_heads
    dim_out_p = packed["wo"].shape[-1]                # lane-padded at pack time

    if batch_block is None:
        batch_block = B        # single fat step (best on single-TC v5e/v6e);
                               # on v7x pass batch_block=B//2 for 2 TCs.
    if B % batch_block != 0:
        raise ValueError("batch must be divisible by batch_block")
    steps = B // batch_block

    kernel = functools.partial(mha_kernel, num_heads=H, dim_k=dim_k,
                               dim_v=dim_v, use_bf16=use_bf16)

    flops = 2 * B * (
        Sq * dim_in * H * dim_k            # Q projection
        + Sk * dim_in * H * dim_k          # K projection
        + Sk * dim_in * H * dim_v          # V projection
        + H * Sq * Sk * dim_k              # Q @ K^T
        + H * Sq * Sk * dim_v              # P @ V
        + Sq * H * dim_v * dim_out_p)      # output projection (padded lanes)
    bytes_accessed = (xq.nbytes + xk.nbytes + xv.nbytes
                      + 4 * B * Sq * dim_out_p
                      + sum(int(packed[k].nbytes) for k in packed))
    cost = pl.CostEstimate(flops=int(flops),
                           transcendentals=int(B * H * Sq * (Sk + 1)),
                           bytes_accessed=int(bytes_accessed))

    grid_spec = pltpu.PrefetchScalarGridSpec(
        num_scalar_prefetch=0,
        grid=(steps,),
        in_specs=[
            # activations: batch_block rows per step
            pl.BlockSpec((batch_block, Sq, dim_in), lambda b: (b, 0, 0)),   # xq
            pl.BlockSpec((batch_block, Sk, dim_in), lambda b: (b, 0, 0)),   # xk
            pl.BlockSpec((batch_block, Sk, dim_in), lambda b: (b, 0, 0)),   # xv
            # weights / biases: full arrays, constant block index -> loaded once
            pl.BlockSpec((dim_in, H * dim_k), lambda b: (0, 0)),            # Wq
            pl.BlockSpec((dim_in, H * dim_k), lambda b: (0, 0)),            # Wk
            pl.BlockSpec((dim_in, H * dim_v), lambda b: (0, 0)),            # Wv
            pl.BlockSpec((H * dim_v, dim_out_p), lambda b: (0, 0)),         # Wo
            pl.BlockSpec((1, H * dim_k), lambda b: (0, 0)),                 # bq
            pl.BlockSpec((1, H * dim_k), lambda b: (0, 0)),                 # bk
            pl.BlockSpec((1, H * dim_v), lambda b: (0, 0)),                 # bv
            pl.BlockSpec((1, dim_out_p), lambda b: (0, 0)),                 # bo
        ],
        out_specs=pl.BlockSpec((batch_block, Sq, dim_out_p),
                               lambda b: (b, 0, 0)),
    )

    out = pl.pallas_call(
        kernel,
        out_shape=jax.ShapeDtypeStruct((B, Sq, dim_out_p), jnp.float32),
        grid_spec=grid_spec,
        compiler_params=pltpu.CompilerParams(
            dimension_semantics=("parallel",)),
        cost_estimate=cost,
    )(xq, xk, xv,
      packed["wq"], packed["wk"], packed["wv"], packed["wo"],
      packed["bq"], packed["bk"], packed["bv"], packed["bo"])

    if dim_out_p != dim_in:
        out = out[:, :, :dim_in]       # drop lane padding added at pack time
    return out


# ----------------------------------------------------------------------------
# Parameter construction (mirrors the per-head nn.Linear layers of the module)
# ----------------------------------------------------------------------------
def init_params(key, num_heads, dim_in, dim_k, dim_v):
    ks = jax.random.split(key, 8)
    return {
        "wq": jax.random.normal(ks[0], (num_heads, dim_in, dim_k), jnp.float32) * 0.1,
        "bq": jax.random.normal(ks[1], (num_heads, dim_k), jnp.float32) * 0.1,
        "wk": jax.random.normal(ks[2], (num_heads, dim_in, dim_k), jnp.float32) * 0.1,
        "bk": jax.random.normal(ks[3], (num_heads, dim_k), jnp.float32) * 0.1,
        "wv": jax.random.normal(ks[4], (num_heads, dim_in, dim_v), jnp.float32) * 0.1,
        "bv": jax.random.normal(ks[5], (num_heads, dim_v), jnp.float32) * 0.1,
        # final linear: (num_heads*dim_v -> dim_in) in x @ W form; rows
        # [h*dim_v:(h+1)*dim_v] correspond to head h (matches concat order).
        "wo": jax.random.normal(ks[6], (num_heads * dim_v, dim_in), jnp.float32) * 0.1,
        "bo": jax.random.normal(ks[7], (dim_in,), jnp.float32) * 0.1,
    }


def pack_params(p, use_bf16=True):
    """Head-fuse, scale-fold, lane-pad and (optionally) bf16-cast the weights.

    Constant, one-time transforms:
      * 1/sqrt(dim_k) softmax scale folded into Wq and bq.
      * Wo / bo zero-padded on the output axis to a multiple of 128 lanes so
        the kernel's stores and Wo loads are lane-dense.
      * Weights stored in bf16 (MXU operands); biases stay f32 (added to f32
        accumulators).
    """
    H, dim_in, dim_k = p["wq"].shape
    dim_v = p["wv"].shape[-1]
    wdt = jnp.bfloat16 if use_bf16 else jnp.float32
    scale = 1.0 / math.sqrt(dim_k)

    wq = (jnp.transpose(p["wq"], (1, 0, 2)) * scale).reshape(dim_in, H * dim_k)
    wk = jnp.transpose(p["wk"], (1, 0, 2)).reshape(dim_in, H * dim_k)
    wv = jnp.transpose(p["wv"], (1, 0, 2)).reshape(dim_in, H * dim_v)

    dim_out_p = ((dim_in + LANE - 1) // LANE) * LANE
    wo = jnp.zeros((H * dim_v, dim_out_p), jnp.float32).at[:, :dim_in].set(p["wo"])
    bo = jnp.zeros((1, dim_out_p), jnp.float32).at[0, :dim_in].set(p["bo"])

    return {
        "wq": wq.astype(wdt),
        "wk": wk.astype(wdt),
        "wv": wv.astype(wdt),
        "wo": wo.astype(wdt),
        "bq": (p["bq"].reshape(1, H * dim_k) * scale).astype(jnp.float32),
        "bk": p["bk"].reshape(1, H * dim_k).astype(jnp.float32),
        "bv": p["bv"].reshape(1, H * dim_v).astype(jnp.float32),
        "bo": bo,
    }


def reference_mha(xq, xk, xv, p):
    """Pure-JAX reference mirroring the PyTorch module (per-head loop)."""
    H = p["wq"].shape[0]
    heads = []
    for h in range(H):
        q = xq @ p["wq"][h] + p["bq"][h]
        k = xk @ p["wk"][h] + p["bk"][h]
        v = xv @ p["wv"][h] + p["bv"][h]
        s = jnp.einsum("bqd,bkd->bqk", q, k) / math.sqrt(q.shape[-1])
        a = jax.nn.softmax(s, axis=-1)
        heads.append(jnp.einsum("bqk,bkd->bqd", a, v))
    cat = jnp.concatenate(heads, axis=-1)
    return cat @ p["wo"] + p["bo"]


if __name__ == "__main__":
    B, Sq, Sk = 2, 8, 8
    num_heads, dim_in, dim_k, dim_v = 4, 32, 16, 16

    key = jax.random.PRNGKey(0)
    kq, kk, kv, kp = jax.random.split(key, 4)

    xq = jax.random.normal(kq, (B, Sq, dim_in), dtype=jnp.float32)
    xk = jax.random.normal(kk, (B, Sk, dim_in), dtype=jnp.float32)
    xv = jax.random.normal(kv, (B, Sk, dim_in), dtype=jnp.float32)

    per_head = init_params(kp, num_heads, dim_in, dim_k, dim_v)
    ref = reference_mha(xq, xk, xv, per_head)

    # Default path: bf16 MXU operands on every generation, f32 accumulation.
    out = multi_head_attention(xq, xk, xv, pack_params(per_head, use_bf16=True),
                               num_heads, dim_k, dim_v, use_bf16=True)
    out = jax.block_until_ready(out)
    np.testing.assert_allclose(np.asarray(out), np.asarray(ref),
                               rtol=5e-2, atol=5e-2)

    # f32 operand path (reference-grade accuracy).
    out32 = multi_head_attention(xq, xk, xv, pack_params(per_head, use_bf16=False),
                                 num_heads, dim_k, dim_v, use_bf16=False)
    out32 = jax.block_until_ready(out32)
    np.testing.assert_allclose(np.asarray(out32), np.asarray(ref),
                               rtol=1e-2, atol=1e-2)

    print("KERNEL_OK")
</pallas_src>

<mosaic_0001>
module attributes {stable_mosaic.version = 11 : i64} {
  func.func @mha_kernel(%arg0: i32, %arg1: memref<2x8x32xf32, #tpu.memory_space<vmem>>, %arg2: memref<2x8x32xf32, #tpu.memory_space<vmem>>, %arg3: memref<2x8x32xf32, #tpu.memory_space<vmem>>, %arg4: memref<32x64xbf16, #tpu.memory_space<vmem>>, %arg5: memref<32x64xbf16, #tpu.memory_space<vmem>>, %arg6: memref<32x64xbf16, #tpu.memory_space<vmem>>, %arg7: memref<64x128xbf16, #tpu.memory_space<vmem>>, %arg8: memref<1x64xf32, #tpu.memory_space<vmem>>, %arg9: memref<1x64xf32, #tpu.memory_space<vmem>>, %arg10: memref<1x64xf32, #tpu.memory_space<vmem>>, %arg11: memref<1x128xf32, #tpu.memory_space<vmem>>, %arg12: memref<2x8x128xf32, #tpu.memory_space<vmem>>) attributes {dimension_semantics = [#tpu.dimension_semantics<parallel>], iteration_bounds = array<i64: 1>, scalar_prefetch = 0 : i64, scratch_operands = 0 : i64, tpu.core_type = #tpu.core_type<tc>, window_params = [{transform_indices = @transform_0, window_bounds = array<i64: 2, 8, 32>}, {transform_indices = @transform_1, window_bounds = array<i64: 2, 8, 32>}, {transform_indices = @transform_2, window_bounds = array<i64: 2, 8, 32>}, {pipeline_mode = #tpu.pipeline_mode<synchronous>, transform_indices = @transform_3, window_bounds = array<i64: 32, 64>}, {pipeline_mode = #tpu.pipeline_mode<synchronous>, transform_indices = @transform_4, window_bounds = array<i64: 32, 64>}, {pipeline_mode = #tpu.pipeline_mode<synchronous>, transform_indices = @transform_5, window_bounds = array<i64: 32, 64>}, {pipeline_mode = #tpu.pipeline_mode<synchronous>, transform_indices = @transform_6, window_bounds = array<i64: 64, 128>}, {pipeline_mode = #tpu.pipeline_mode<synchronous>, transform_indices = @transform_7, window_bounds = array<i64: 1, 64>}, {pipeline_mode = #tpu.pipeline_mode<synchronous>, transform_indices = @transform_8, window_bounds = array<i64: 1, 64>}, {pipeline_mode = #tpu.pipeline_mode<synchronous>, transform_indices = @transform_9, window_bounds = array<i64: 1, 64>}, {pipeline_mode = #tpu.pipeline_mode<synchronous>, transform_indices = @transform_10, window_bounds = array<i64: 1, 128>}, {transform_indices = @transform_11, window_bounds = array<i64: 2, 8, 128>}]} {
    %c0 = arith.constant 0 : index
    %c0_0 = arith.constant 0 : index
    %c0_1 = arith.constant 0 : index
    %0 = vector.load %arg1[%c0, %c0_0, %c0_1] : memref<2x8x32xf32, #tpu.memory_space<vmem>>, vector<2x8x32xf32>
    %1 = vector.shape_cast %0 : vector<2x8x32xf32> to vector<16x32xf32>
    %c0_2 = arith.constant 0 : index
    %c0_3 = arith.constant 0 : index
    %c0_4 = arith.constant 0 : index
    %2 = vector.load %arg2[%c0_2, %c0_3, %c0_4] : memref<2x8x32xf32, #tpu.memory_space<vmem>>, vector<2x8x32xf32>
    %3 = vector.shape_cast %2 : vector<2x8x32xf32> to vector<16x32xf32>
    %c0_5 = arith.constant 0 : index
    %c0_6 = arith.constant 0 : index
    %c0_7 = arith.constant 0 : index
    %4 = vector.load %arg3[%c0_5, %c0_6, %c0_7] : memref<2x8x32xf32, #tpu.memory_space<vmem>>, vector<2x8x32xf32>
    %5 = vector.shape_cast %4 : vector<2x8x32xf32> to vector<16x32xf32>
    %c0_8 = arith.constant 0 : index
    %c0_9 = arith.constant 0 : index
    %6 = vector.load %arg4[%c0_8, %c0_9] : memref<32x64xbf16, #tpu.memory_space<vmem>>, vector<32x64xbf16>
    %7 = arith.truncf %1 : vector<16x32xf32> to vector<16x32xbf16>
    %cst = arith.constant dense<0.000000e+00> : vector<16x64xf32>
    %8 = tpu.matmul %7, %6, %cst {dimension_numbers = #tpu.dot_dimension_numbers<[1], [0], [0], [1], [0, 0, 1, 1], [], []>} : vector<16x32xbf16>, vector<32x64xbf16>, vector<16x64xf32> -> vector<16x64xf32>
    %c0_10 = arith.constant 0 : index
    %c0_11 = arith.constant 0 : index
    %9 = vector.load %arg8[%c0_10, %c0_11] : memref<1x64xf32, #tpu.memory_space<vmem>>, vector<1x64xf32>
    %10 = vector.broadcast %9 : vector<1x64xf32> to vector<16x64xf32>
    %11 = arith.addf %8, %10 : vector<16x64xf32>
    %12 = vector.shape_cast %11 : vector<16x64xf32> to vector<2x8x64xf32>
    %c0_12 = arith.constant 0 : index
    %c0_13 = arith.constant 0 : index
    %13 = vector.load %arg5[%c0_12, %c0_13] : memref<32x64xbf16, #tpu.memory_space<vmem>>, vector<32x64xbf16>
    %14 = arith.truncf %3 : vector<16x32xf32> to vector<16x32xbf16>
    %cst_14 = arith.constant dense<0.000000e+00> : vector<16x64xf32>
    %15 = tpu.matmul %14, %13, %cst_14 {dimension_numbers = #tpu.dot_dimension_numbers<[1], [0], [0], [1], [0, 0, 1, 1], [], []>} : vector<16x32xbf16>, vector<32x64xbf16>, vector<16x64xf32> -> vector<16x64xf32>
    %c0_15 = arith.constant 0 : index
    %c0_16 = arith.constant 0 : index
    %16 = vector.load %arg9[%c0_15, %c0_16] : memref<1x64xf32, #tpu.memory_space<vmem>>, vector<1x64xf32>
    %17 = vector.broadcast %16 : vector<1x64xf32> to vector<16x64xf32>
    %18 = arith.addf %15, %17 : vector<16x64xf32>
    %19 = vector.shape_cast %18 : vector<16x64xf32> to vector<2x8x64xf32>
    %c0_17 = arith.constant 0 : index
    %c0_18 = arith.constant 0 : index
    %20 = vector.load %arg6[%c0_17, %c0_18] : memref<32x64xbf16, #tpu.memory_space<vmem>>, vector<32x64xbf16>
    %21 = arith.truncf %5 : vector<16x32xf32> to vector<16x32xbf16>
    %cst_19 = arith.constant dense<0.000000e+00> : vector<16x64xf32>
    %22 = tpu.matmul %21, %20, %cst_19 {dimension_numbers = #tpu.dot_dimension_numbers<[1], [0], [0], [1], [0, 0, 1, 1], [], []>} : vector<16x32xbf16>, vector<32x64xbf16>, vector<16x64xf32> -> vector<16x64xf32>
    %c0_20 = arith.constant 0 : index
    %c0_21 = arith.constant 0 : index
    %23 = vector.load %arg10[%c0_20, %c0_21] : memref<1x64xf32, #tpu.memory_space<vmem>>, vector<1x64xf32>
    %24 = vector.broadcast %23 : vector<1x64xf32> to vector<16x64xf32>
    %25 = arith.addf %22, %24 : vector<16x64xf32>
    %26 = vector.shape_cast %25 : vector<16x64xf32> to vector<2x8x64xf32>
    %c0_22 = arith.constant 0 : index
    %c0_23 = arith.constant 0 : index
    %27 = vector.load %arg7[%c0_22, %c0_23] : memref<64x128xbf16, #tpu.memory_space<vmem>>, vector<64x128xbf16>
    %cst_24 = arith.constant 0.000000e+00 : f32
    %28 = vector.broadcast %cst_24 : f32 to vector<16x128xf32>
    %29 = vector.extract_strided_slice %12 {offsets = [0, 0, 0], sizes = [2, 8, 16], strides = [1, 1, 1]} : vector<2x8x64xf32> to vector<2x8x16xf32>
    %30 = vector.extract_strided_slice %19 {offsets = [0, 0, 0], sizes = [2, 8, 16], strides = [1, 1, 1]} : vector<2x8x64xf32> to vector<2x8x16xf32>
    %31 = vector.extract_strided_slice %26 {offsets = [0, 0, 0], sizes = [2, 8, 16], strides = [1, 1, 1]} : vector<2x8x64xf32> to vector<2x8x16xf32>
    %32 = arith.truncf %29 : vector<2x8x16xf32> to vector<2x8x16xbf16>
    %33 = arith.truncf %30 : vector<2x8x16xf32> to vector<2x8x16xbf16>
    "tpu.trace_start"() <{level = 10 : i32, message = "bqd,bkd->bqk"}> : () -> ()
    %cst_25 = arith.constant dense<0.000000e+00> : vector<2x8x8xf32>
    %34 = tpu.matmul %32, %33, %cst_25 {dimension_numbers = #tpu.dot_dimension_numbers<[2], [2], [1], [1], [0, 0, 0, 1, 1, 1], [0], [0]>} : vector<2x8x16xbf16>, vector<2x8x16xbf16>, vector<2x8x8xf32> -> vector<2x8x8xf32>
    "tpu.trace_stop"() : () -> ()
    %cst_26 = arith.constant dense<0xFF800000> : vector<2x8xf32>
    %35 = vector.multi_reduction <maximumf>, %34, %cst_26 [2] : vector<2x8x8xf32> to vector<2x8xf32>
    %36 = vector.shape_cast %35 : vector<2x8xf32> to vector<2x8x1xf32>
    %37 = vector.broadcast %36 : vector<2x8x1xf32> to vector<2x8x8xf32>
    %38 = arith.subf %34, %37 : vector<2x8x8xf32>
    %39 = math.exp %38 : vector<2x8x8xf32>
    %cst_27 = arith.constant dense<0.000000e+00> : vector<2x8xf32>
    %40 = vector.multi_reduction <add>, %39, %cst_27 [2] : vector<2x8x8xf32> to vector<2x8xf32>
    %41 = vector.shape_cast %40 : vector<2x8xf32> to vector<2x8x1xf32>
    %42 = arith.truncf %39 : vector<2x8x8xf32> to vector<2x8x8xbf16>
    %43 = arith.truncf %31 : vector<2x8x16xf32> to vector<2x8x16xbf16>
    "tpu.trace_start"() <{level = 10 : i32, message = "bqk,bkd->bqd"}> : () -> ()
    %cst_28 = arith.constant dense<0.000000e+00> : vector<2x8x16xf32>
    %44 = tpu.matmul %42, %43, %cst_28 {dimension_numbers = #tpu.dot_dimension_numbers<[2], [1], [1], [2], [0, 0, 0, 1, 1, 2], [0], [0]>} : vector<2x8x8xbf16>, vector<2x8x16xbf16>, vector<2x8x16xf32> -> vector<2x8x16xf32>
    "tpu.trace_stop"() : () -> ()
    %45 = tpu.reciprocal %41 {approx = true} : vector<2x8x1xf32> -> vector<2x8x1xf32>
    %46 = vector.broadcast %45 : vector<2x8x1xf32> to vector<2x8x16xf32>
    %47 = arith.mulf %44, %46 : vector<2x8x16xf32>
    %48 = vector.extract_strided_slice %27 {offsets = [0, 0], sizes = [16, 128], strides = [1, 1]} : vector<64x128xbf16> to vector<16x128xbf16>
    %49 = vector.shape_cast %47 : vector<2x8x16xf32> to vector<16x16xf32>
    %50 = arith.truncf %49 : vector<16x16xf32> to vector<16x16xbf16>
    %cst_29 = arith.constant dense<0.000000e+00> : vector<16x128xf32>
    %51 = tpu.matmul %50, %48, %cst_29 {dimension_numbers = #tpu.dot_dimension_numbers<[1], [0], [0], [1], [0, 0, 1, 1], [], []>} : vector<16x16xbf16>, vector<16x128xbf16>, vector<16x128xf32> -> vector<16x128xf32>
    %52 = arith.addf %28, %51 : vector<16x128xf32>
    %53 = vector.extract_strided_slice %12 {offsets = [0, 0, 16], sizes = [2, 8, 16], strides = [1, 1, 1]} : vector<2x8x64xf32> to vector<2x8x16xf32>
    %54 = vector.extract_strided_slice %19 {offsets = [0, 0, 16], sizes = [2, 8, 16], strides = [1, 1, 1]} : vector<2x8x64xf32> to vector<2x8x16xf32>
    %55 = vector.extract_strided_slice %26 {offsets = [0, 0, 16], sizes = [2, 8, 16], strides = [1, 1, 1]} : vector<2x8x64xf32> to vector<2x8x16xf32>
    %56 = arith.truncf %53 : vector<2x8x16xf32> to vector<2x8x16xbf16>
    %57 = arith.truncf %54 : vector<2x8x16xf32> to vector<2x8x16xbf16>
    "tpu.trace_start"() <{level = 10 : i32, message = "bqd,bkd->bqk"}> : () -> ()
    %cst_30 = arith.constant dense<0.000000e+00> : vector<2x8x8xf32>
    %58 = tpu.matmul %56, %57, %cst_30 {dimension_numbers = #tpu.dot_dimension_numbers<[2], [2], [1], [1], [0, 0, 0, 1, 1, 1], [0], [0]>} : vector<2x8x16xbf16>, vector<2x8x16xbf16>, vector<2x8x8xf32> -> vector<2x8x8xf32>
    "tpu.trace_stop"() : () -> ()
    %cst_31 = arith.constant dense<0xFF800000> : vector<2x8xf32>
    %59 = vector.multi_reduction <maximumf>, %58, %cst_31 [2] : vector<2x8x8xf32> to vector<2x8xf32>
    %60 = vector.shape_cast %59 : vector<2x8xf32> to vector<2x8x1xf32>
    %61 = vector.broadcast %60 : vector<2x8x1xf32> to vector<2x8x8xf32>
    %62 = arith.subf %58, %61 : vector<2x8x8xf32>
    %63 = math.exp %62 : vector<2x8x8xf32>
    %cst_32 = arith.constant dense<0.000000e+00> : vector<2x8xf32>
    %64 = vector.multi_reduction <add>, %63, %cst_32 [2] : vector<2x8x8xf32> to vector<2x8xf32>
    %65 = vector.shape_cast %64 : vector<2x8xf32> to vector<2x8x1xf32>
    %66 = arith.truncf %63 : vector<2x8x8xf32> to vector<2x8x8xbf16>
    %67 = arith.truncf %55 : vector<2x8x16xf32> to vector<2x8x16xbf16>
    "tpu.trace_start"() <{level = 10 : i32, message = "bqk,bkd->bqd"}> : () -> ()
    %cst_33 = arith.constant dense<0.000000e+00> : vector<2x8x16xf32>
    %68 = tpu.matmul %66, %67, %cst_33 {dimension_numbers = #tpu.dot_dimension_numbers<[2], [1], [1], [2], [0, 0, 0, 1, 1, 2], [0], [0]>} : vector<2x8x8xbf16>, vector<2x8x16xbf16>, vector<2x8x16xf32> -> vector<2x8x16xf32>
    "tpu.trace_stop"() : () -> ()
    %69 = tpu.reciprocal %65 {approx = true} : vector<2x8x1xf32> -> vector<2x8x1xf32>
    %70 = vector.broadcast %69 : vector<2x8x1xf32> to vector<2x8x16xf32>
    %71 = arith.mulf %68, %70 : vector<2x8x16xf32>
    %72 = vector.extract_strided_slice %27 {offsets = [16, 0], sizes = [16, 128], strides = [1, 1]} : vector<64x128xbf16> to vector<16x128xbf16>
    %73 = vector.shape_cast %71 : vector<2x8x16xf32> to vector<16x16xf32>
    %74 = arith.truncf %73 : vector<16x16xf32> to vector<16x16xbf16>
    %cst_34 = arith.constant dense<0.000000e+00> : vector<16x128xf32>
    %75 = tpu.matmul %74, %72, %cst_34 {dimension_numbers = #tpu.dot_dimension_numbers<[1], [0], [0], [1], [0, 0, 1, 1], [], []>} : vector<16x16xbf16>, vector<16x128xbf16>, vector<16x128xf32> -> vector<16x128xf32>
    %76 = arith.addf %52, %75 : vector<16x128xf32>
    %77 = vector.extract_strided_slice %12 {offsets = [0, 0, 32], sizes = [2, 8, 16], strides = [1, 1, 1]} : vector<2x8x64xf32> to vector<2x8x16xf32>
    %78 = vector.extract_strided_slice %19 {offsets = [0, 0, 32], sizes = [2, 8, 16], strides = [1, 1, 1]} : vector<2x8x64xf32> to vector<2x8x16xf32>
    %79 = vector.extract_strided_slice %26 {offsets = [0, 0, 32], sizes = [2, 8, 16], strides = [1, 1, 1]} : vector<2x8x64xf32> to vector<2x8x16xf32>
    %80 = arith.truncf %77 : vector<2x8x16xf32> to vector<2x8x16xbf16>
    %81 = arith.truncf %78 : vector<2x8x16xf32> to vector<2x8x16xbf16>
    "tpu.trace_start"() <{level = 10 : i32, message = "bqd,bkd->bqk"}> : () -> ()
    %cst_35 = arith.constant dense<0.000000e+00> : vector<2x8x8xf32>
    %82 = tpu.matmul %80, %81, %cst_35 {dimension_numbers = #tpu.dot_dimension_numbers<[2], [2], [1], [1], [0, 0, 0, 1, 1, 1], [0], [0]>} : vector<2x8x16xbf16>, vector<2x8x16xbf16>, vector<2x8x8xf32> -> vector<2x8x8xf32>
    "tpu.trace_stop"() : () -> ()
    %cst_36 = arith.constant dense<0xFF800000> : vector<2x8xf32>
    %83 = vector.multi_reduction <maximumf>, %82, %cst_36 [2] : vector<2x8x8xf32> to vector<2x8xf32>
    %84 = vector.shape_cast %83 : vector<2x8xf32> to vector<2x8x1xf32>
    %85 = vector.broadcast %84 : vector<2x8x1xf32> to vector<2x8x8xf32>
    %86 = arith.subf %82, %85 : vector<2x8x8xf32>
    %87 = math.exp %86 : vector<2x8x8xf32>
    %cst_37 = arith.constant dense<0.000000e+00> : vector<2x8xf32>
    %88 = vector.multi_reduction <add>, %87, %cst_37 [2] : vector<2x8x8xf32> to vector<2x8xf32>
    %89 = vector.shape_cast %88 : vector<2x8xf32> to vector<2x8x1xf32>
    %90 = arith.truncf %87 : vector<2x8x8xf32> to vector<2x8x8xbf16>
    %91 = arith.truncf %79 : vector<2x8x16xf32> to vector<2x8x16xbf16>
    "tpu.trace_start"() <{level = 10 : i32, message = "bqk,bkd->bqd"}> : () -> ()
    %cst_38 = arith.constant dense<0.000000e+00> : vector<2x8x16xf32>
    %92 = tpu.matmul %90, %91, %cst_38 {dimension_numbers = #tpu.dot_dimension_numbers<[2], [1], [1], [2], [0, 0, 0, 1, 1, 2], [0], [0]>} : vector<2x8x8xbf16>, vector<2x8x16xbf16>, vector<2x8x16xf32> -> vector<2x8x16xf32>
    "tpu.trace_stop"() : () -> ()
    %93 = tpu.reciprocal %89 {approx = true} : vector<2x8x1xf32> -> vector<2x8x1xf32>
    %94 = vector.broadcast %93 : vector<2x8x1xf32> to vector<2x8x16xf32>
    %95 = arith.mulf %92, %94 : vector<2x8x16xf32>
    %96 = vector.extract_strided_slice %27 {offsets = [32, 0], sizes = [16, 128], strides = [1, 1]} : vector<64x128xbf16> to vector<16x128xbf16>
    %97 = vector.shape_cast %95 : vector<2x8x16xf32> to vector<16x16xf32>
    %98 = arith.truncf %97 : vector<16x16xf32> to vector<16x16xbf16>
    %cst_39 = arith.constant dense<0.000000e+00> : vector<16x128xf32>
    %99 = tpu.matmul %98, %96, %cst_39 {dimension_numbers = #tpu.dot_dimension_numbers<[1], [0], [0], [1], [0, 0, 1, 1], [], []>} : vector<16x16xbf16>, vector<16x128xbf16>, vector<16x128xf32> -> vector<16x128xf32>
    %100 = arith.addf %76, %99 : vector<16x128xf32>
    %101 = vector.extract_strided_slice %12 {offsets = [0, 0, 48], sizes = [2, 8, 16], strides = [1, 1, 1]} : vector<2x8x64xf32> to vector<2x8x16xf32>
    %102 = vector.extract_strided_slice %19 {offsets = [0, 0, 48], sizes = [2, 8, 16], strides = [1, 1, 1]} : vector<2x8x64xf32> to vector<2x8x16xf32>
    %103 = vector.extract_strided_slice %26 {offsets = [0, 0, 48], sizes = [2, 8, 16], strides = [1, 1, 1]} : vector<2x8x64xf32> to vector<2x8x16xf32>
    %104 = arith.truncf %101 : vector<2x8x16xf32> to vector<2x8x16xbf16>
    %105 = arith.truncf %102 : vector<2x8x16xf32> to vector<2x8x16xbf16>
    "tpu.trace_start"() <{level = 10 : i32, message = "bqd,bkd->bqk"}> : () -> ()
    %cst_40 = arith.constant dense<0.000000e+00> : vector<2x8x8xf32>
    %106 = tpu.matmul %104, %105, %cst_40 {dimension_numbers = #tpu.dot_dimension_numbers<[2], [2], [1], [1], [0, 0, 0, 1, 1, 1], [0], [0]>} : vector<2x8x16xbf16>, vector<2x8x16xbf16>, vector<2x8x8xf32> -> vector<2x8x8xf32>
    "tpu.trace_stop"() : () -> ()
    %cst_41 = arith.constant dense<0xFF800000> : vector<2x8xf32>
    %107 = vector.multi_reduction <maximumf>, %106, %cst_41 [2] : vector<2x8x8xf32> to vector<2x8xf32>
    %108 = vector.shape_cast %107 : vector<2x8xf32> to vector<2x8x1xf32>
    %109 = vector.broadcast %108 : vector<2x8x1xf32> to vector<2x8x8xf32>
    %110 = arith.subf %106, %109 : vector<2x8x8xf32>
    %111 = math.exp %110 : vector<2x8x8xf32>
    %cst_42 = arith.constant dense<0.000000e+00> : vector<2x8xf32>
    %112 = vector.multi_reduction <add>, %111, %cst_42 [2] : vector<2x8x8xf32> to vector<2x8xf32>
    %113 = vector.shape_cast %112 : vector<2x8xf32> to vector<2x8x1xf32>
    %114 = arith.truncf %111 : vector<2x8x8xf32> to vector<2x8x8xbf16>
    %115 = arith.truncf %103 : vector<2x8x16xf32> to vector<2x8x16xbf16>
    "tpu.trace_start"() <{level = 10 : i32, message = "bqk,bkd->bqd"}> : () -> ()
    %cst_43 = arith.constant dense<0.000000e+00> : vector<2x8x16xf32>
    %116 = tpu.matmul %114, %115, %cst_43 {dimension_numbers = #tpu.dot_dimension_numbers<[2], [1], [1], [2], [0, 0, 0, 1, 1, 2], [0], [0]>} : vector<2x8x8xbf16>, vector<2x8x16xbf16>, vector<2x8x16xf32> -> vector<2x8x16xf32>
    "tpu.trace_stop"() : () -> ()
    %117 = tpu.reciprocal %113 {approx = true} : vector<2x8x1xf32> -> vector<2x8x1xf32>
    %118 = vector.broadcast %117 : vector<2x8x1xf32> to vector<2x8x16xf32>
    %119 = arith.mulf %116, %118 : vector<2x8x16xf32>
    %120 = vector.extract_strided_slice %27 {offsets = [48, 0], sizes = [16, 128], strides = [1, 1]} : vector<64x128xbf16> to vector<16x128xbf16>
    %121 = vector.shape_cast %119 : vector<2x8x16xf32> to vector<16x16xf32>
    %122 = arith.truncf %121 : vector<16x16xf32> to vector<16x16xbf16>
    %cst_44 = arith.constant dense<0.000000e+00> : vector<16x128xf32>
    %123 = tpu.matmul %122, %120, %cst_44 {dimension_numbers = #tpu.dot_dimension_numbers<[1], [0], [0], [1], [0, 0, 1, 1], [], []>} : vector<16x16xbf16>, vector<16x128xbf16>, vector<16x128xf32> -> vector<16x128xf32>
    %124 = arith.addf %100, %123 : vector<16x128xf32>
    %c0_45 = arith.constant 0 : index
    %c0_46 = arith.constant 0 : index
    %125 = vector.load %arg11[%c0_45, %c0_46] : memref<1x128xf32, #tpu.memory_space<vmem>>, vector<1x128xf32>
    %126 = vector.broadcast %125 : vector<1x128xf32> to vector<16x128xf32>
    %127 = arith.addf %124, %126 : vector<16x128xf32>
    %128 = vector.shape_cast %127 : vector<16x128xf32> to vector<2x8x128xf32>
    %c0_47 = arith.constant 0 : index
    %c0_48 = arith.constant 0 : index
    %c0_49 = arith.constant 0 : index
    %129 = vector.load %arg12[%c0_47, %c0_48, %c0_49] : memref<2x8x128xf32, #tpu.memory_space<vmem>>, vector<2x8x128xf32>
    tpu.vector_store %arg12[%c0_47, %c0_48, %c0_49], %128 {strides = array<i32>} : memref<2x8x128xf32, #tpu.memory_space<vmem>>, vector<2x8x128xf32>,
    return
  }
  func.func @transform_0(%arg0: i32) -> (i32, i32, i32) {
    %c0_i32 = arith.constant 0 : i32
    %c0_i32_0 = arith.constant 0 : i32
    %c0_i32_1 = arith.constant 0 : i32
    return %arg0, %c0_i32, %c0_i32_0 : i32, i32, i32
  }
  func.func @transform_1(%arg0: i32) -> (i32, i32, i32) {
    %c0_i32 = arith.constant 0 : i32
    %c0_i32_0 = arith.constant 0 : i32
    %c0_i32_1 = arith.constant 0 : i32
    return %arg0, %c0_i32, %c0_i32_0 : i32, i32, i32
  }
  func.func @transform_2(%arg0: i32) -> (i32, i32, i32) {
    %c0_i32 = arith.constant 0 : i32
    %c0_i32_0 = arith.constant 0 : i32
    %c0_i32_1 = arith.constant 0 : i32
    return %arg0, %c0_i32, %c0_i32_0 : i32, i32, i32
  }
  func.func @transform_3(%arg0: i32) -> (i32, i32) {
    %c0_i32 = arith.constant 0 : i32
    %c0_i32_0 = arith.constant 0 : i32
    %c0_i32_1 = arith.constant 0 : i32
    return %c0_i32, %c0_i32_0 : i32, i32
  }
  func.func @transform_4(%arg0: i32) -> (i32, i32) {
    %c0_i32 = arith.constant 0 : i32
    %c0_i32_0 = arith.constant 0 : i32
    %c0_i32_1 = arith.constant 0 : i32
    return %c0_i32, %c0_i32_0 : i32, i32
  }
  func.func @transform_5(%arg0: i32) -> (i32, i32) {
    %c0_i32 = arith.constant 0 : i32
    %c0_i32_0 = arith.constant 0 : i32
    %c0_i32_1 = arith.constant 0 : i32
    return %c0_i32, %c0_i32_0 : i32, i32
  }
  func.func @transform_6(%arg0: i32) -> (i32, i32) {
    %c0_i32 = arith.constant 0 : i32
    %c0_i32_0 = arith.constant 0 : i32
    %c0_i32_1 = arith.constant 0 : i32
    return %c0_i32, %c0_i32_0 : i32, i32
  }
  func.func @transform_7(%arg0: i32) -> (i32, i32) {
    %c0_i32 = arith.constant 0 : i32
    %c0_i32_0 = arith.constant 0 : i32
    %c0_i32_1 = arith.constant 0 : i32
    return %c0_i32, %c0_i32_0 : i32, i32
  }
  func.func @transform_8(%arg0: i32) -> (i32, i32) {
    %c0_i32 = arith.constant 0 : i32
    %c0_i32_0 = arith.constant 0 : i32
    %c0_i32_1 = arith.constant 0 : i32
    return %c0_i32, %c0_i32_0 : i32, i32
  }
  func.func @transform_9(%arg0: i32) -> (i32, i32) {
    %c0_i32 = arith.constant 0 : i32
    %c0_i32_0 = arith.constant 0 : i32
    %c0_i32_1 = arith.constant 0 : i32
    return %c0_i32, %c0_i32_0 : i32, i32
  }
  func.func @transform_10(%arg0: i32) -> (i32, i32) {
    %c0_i32 = arith.constant 0 : i32
    %c0_i32_0 = arith.constant 0 : i32
    %c0_i32_1 = arith.constant 0 : i32
    return %c0_i32, %c0_i32_0 : i32, i32
  }
  func.func @transform_11(%arg0: i32) -> (i32, i32, i32) {
    %c0_i32 = arith.constant 0 : i32
    %c0_i32_0 = arith.constant 0 : i32
    %c0_i32_1 = arith.constant 0 : i32
    return %arg0, %c0_i32, %c0_i32_0 : i32, i32, i32
  }
}

</mosaic_0001>

<bundles_post_ra>
// kernel: tpu_custom_call.1
= control target key start
LH: loop header
LB: loop body
LE: loop exit
PB: predicated region body
PF: predicated region fallthrough
CT: control target
= control target key end

     0   :  { %16 = vsyncpa [#allocation3], 0  ;;  %s2331_s0 = inlined_call_operand.hbm [shape: f32[2,8,32], index: 0, kind: input, shape index: {}]   ;;  %s2332_s1 = inlined_call_operand.hbm [shape: f32[2,8,32], index: 1, kind: input, shape index: {}]   ;;  %s2333_s2 = inlined_call_operand.hbm [shape: f32[2,8,32], index: 2, kind: input, shape index: {}]   ;;  %s2334_s3 = inlined_call_operand.hbm [shape: bf16[32,64], index: 3, kind: input, shape index: {}]   ;;  %s2335_s4 = inlined_call_operand.hbm [shape: bf16[32,64], index: 4, kind: input, shape index: {}]   ;;  %s2336_s5 = inlined_call_operand.vmem [shape: bf16[32,64], index: 5, kind: input, shape index: {}]   ;;  %s2337_s6 = inlined_call_operand.hbm [shape: bf16[64,128], index: 6, kind: input, shape index: {}]   ;;  %s2338_s7 = inlined_call_operand.vmem [shape: f32[1,64], index: 7, kind: input, shape index: {}]   ;;  %s2339_s8 = inlined_call_operand.vmem [shape: f32[1,64], index: 8, kind: input, shape index: {}]   ;;  %s2340_s9 = inlined_call_operand.vmem [shape: f32[1,64], index: 9, kind: input, shape index: {}]   ;;  %s2341_s10 = inlined_call_operand.vmem [shape: f32[1,128], index: 10, kind: input, shape index: {}]   ;;  %s2342_s11 = inlined_call_operand.hbm [shape: f32[2,8,128], index: 11, kind: output, shape index: {}]  }
   0x1   :  { %17 = vsyncpa [#allocation6], 0 }
   0x2   :  { %18 = vsyncpa [#allocation9], 0 }
   0x3   :  { %19 = vsyncpa [#allocation12], 0 }
   0x4   :  { %20 = vsyncpa [#allocation4], 0  ;;  %s1915_s17 = smov [#allocation5]   ;;  %s1916_s19 = smov [#allocation8]  }
   0x5   :  { %s38_s18 = sshll.u32 %s1915_s17, 4  ;;  %s62_s20 = sshll.u32 %s1916_s19, 4  ;;  %s39_s18 = int_to_ptr.vmem [resolvable:$true] %s38_s18  ;;  %s1991_s20 = int_to_ptr.vmem [resolvable:$true] %s62_s20 }
   0x6   :  { %s1751_s23 = scalar_lea.hbm %s2332_s1, 256 }
   0x7   :  { %p1752_p0 = scmp.ne.s32.totalorder %s2332_s1, %s1751_s23  ;;  %p1755_p1 = scmp.lt.u32.totalorder %s1751_s23, %s2332_s1 }
   0x9   :  { %p1757_p2 = pnand %p1755_p1, %p1752_p0 }
   0xb   :  { %1760 = shalt.err (!%p1757_p2)
}
   0xc   :  { %s1761_s28 = scalar_lea.vmem %s39_s18, 256  ;;  %p1766_p4 = scmp.lt.s32.totalorder %s39_s18, %s39_s18 }
   0xd   :  { %p1762_p3 = scmp.ne.s32.totalorder %s39_s18, %s1761_s28  ;;  %p1767_p5 = scmp.lt.s32.totalorder %s1761_s28, %s1761_s28 }
   0xf   :  { %p1768_p6 = por %p1767_p5, %p1766_p4 }
  0x11   :  { %p1769_p7 = pnand %p1768_p6, %p1762_p3 }
  0x13   :  { %1772 = shalt.err (!%p1769_p7)
}
  0x14   :  { %s1917_s29 = smov 128   ;;  %s1918_s30 = smov 8  }
  0x15   :  { %44 = dma.hbm_to_vmem [thread:$0]  %s2332_s1, 256, %s39_s18, [#allocation6], %s1917_s29, %s1917_s29, %s1918_s30  }
  0x16   :  { %s1773_s16 = scalar_lea.hbm %s2334_s3, 256 }
  0x17   :  { %p1774_p8 = scmp.ne.s32.totalorder %s2334_s3, %s1773_s16  ;;  %p1777_p9 = scmp.lt.u32.totalorder %s1773_s16, %s2334_s3 }
  0x19   :  { %p1779_p10 = pnand %p1777_p9, %p1774_p8 }
  0x1b   :  { %1782 = shalt.err (!%p1779_p10)
}
  0x1c   :  { %s1783_s23 = scalar_lea.vmem %s1991_s20, 256  ;;  %p1788_p12 = scmp.lt.s32.totalorder %s1991_s20, %s1991_s20 }
  0x1d   :  { %p1784_p11 = scmp.ne.s32.totalorder %s1991_s20, %s1783_s23  ;;  %p1789_p13 = scmp.lt.s32.totalorder %s1783_s23, %s1783_s23 }
  0x1f   :  { %p1790_p0 = por %p1789_p13, %p1788_p12 }
  0x21   :  { %p1791_p1 = pnand %p1790_p0, %p1784_p11 }
  0x23   :  { %1794 = shalt.err (!%p1791_p1)
}
  0x24   :  { %s1919_s1 = smov 64   ;;  %s1920_s18 = smov 4  }
  0x25   :  { %68 = dma.hbm_to_vmem [thread:$0]  %s2334_s3, 256, %s1991_s20, [#allocation9], %s1919_s1, %s1919_s1, %s1920_s18  }
  0x26   :  { %s1921_s26 = smov [#allocation2]   ;;  %s1922_s28 = smov [#allocation7]  }
  0x27   :  { %s26_s27 = sshll.u32 %s1921_s26, 4  ;;  %s50_s12 = sshll.u32 %s1922_s28, 4  ;;  %s27_s27 = int_to_ptr.vmem [resolvable:$true] %s26_s27  ;;  %s2028_s12 = int_to_ptr.vmem [resolvable:$true] %s50_s12 }
  0x28   :  { %s1795_s15 = scalar_lea.hbm %s2331_s0, 256 }
  0x29   :  { %p1796_p2 = scmp.ne.s32.totalorder %s2331_s0, %s1795_s15  ;;  %p1799_p3 = scmp.lt.u32.totalorder %s1795_s15, %s2331_s0 }
  0x2b   :  { %p1801_p4 = pnand %p1799_p3, %p1796_p2 }
  0x2d   :  { %1804 = shalt.err (!%p1801_p4)
}
  0x2e   :  { %s1805_s3 = scalar_lea.vmem %s27_s27, 256  ;;  %p1810_p6 = scmp.lt.s32.totalorder %s27_s27, %s27_s27 }
  0x2f   :  { %p1806_p5 = scmp.ne.s32.totalorder %s27_s27, %s1805_s3  ;;  %p1811_p7 = scmp.lt.s32.totalorder %s1805_s3, %s1805_s3 }
  0x31   :  { %p1812_p8 = por %p1811_p7, %p1810_p6 }
  0x33   :  { %p1813_p9 = pnand %p1812_p8, %p1806_p5 }
  0x35   :  { %1816 = shalt.err (!%p1813_p9)
}
  0x36   :  { %32 = dma.hbm_to_vmem [thread:$0]  %s2331_s0, 256, %s27_s27, [#allocation3], %s1917_s29, %s1917_s29, %s1918_s30  }
  0x37   :  { %s1817_s25 = scalar_lea.hbm %s2333_s2, 256 }
  0x38   :  { %p1818_p10 = scmp.ne.s32.totalorder %s2333_s2, %s1817_s25  ;;  %p1821_p11 = scmp.lt.u32.totalorder %s1817_s25, %s2333_s2 }
  0x3a   :  { %p1823_p12 = pnand %p1821_p11, %p1818_p10 }
  0x3c   :  { %1826 = shalt.err (!%p1823_p12)
}
  0x3d   :  { %s1827_s15 = scalar_lea.vmem %s2028_s12, 256  ;;  %p1832_p0 = scmp.lt.s32.totalorder %s2028_s12, %s2028_s12 }
  0x3e   :  { %p1828_p13 = scmp.ne.s32.totalorder %s2028_s12, %s1827_s15  ;;  %p1833_p1 = scmp.lt.s32.totalorder %s1827_s15, %s1827_s15 }
  0x40   :  { %p1834_p2 = por %p1833_p1, %p1832_p0 }
  0x42   :  { %p1835_p3 = pnand %p1834_p2, %p1828_p13 }
  0x44   :  { %1838 = shalt.err (!%p1835_p3)
}
  0x45   :  { %56 = dma.hbm_to_vmem [thread:$0]  %s2333_s2, 256, %s2028_s12, [#allocation6], %s1917_s29, %s1917_s29, %s1918_s30  }
  0x46   :  { %s1923_s16 = smov [#allocation10]   ;;  %s1924_s19 = smov [#allocation11]  }
  0x47   :  { %s74_s17 = sshll.u32 %s1923_s16, 4  ;;  %s88_s21 = sshll.u32 %s1924_s19, 4  ;;  %s75_s17 = int_to_ptr.vmem [resolvable:$true] %s74_s17  ;;  %s2065_s21 = int_to_ptr.vmem [resolvable:$true] %s88_s21 }
  0x48   :  { %s1839_s22 = scalar_lea.hbm %s2335_s4, 256 }
  0x49   :  { %p1840_p4 = scmp.ne.s32.totalorder %s2335_s4, %s1839_s22  ;;  %p1843_p5 = scmp.lt.u32.totalorder %s1839_s22, %s2335_s4 }
  0x4b   :  { %p1845_p6 = pnand %p1843_p5, %p1840_p4 }
  0x4d   :  { %1848 = shalt.err (!%p1845_p6)
}
  0x4e   :  { %s1849_s2 = scalar_lea.vmem %s75_s17, 256  ;;  %p1854_p8 = scmp.lt.s32.totalorder %s75_s17, %s75_s17 }
  0x4f   :  { %p1850_p7 = scmp.ne.s32.totalorder %s75_s17, %s1849_s2  ;;  %p1855_p9 = scmp.lt.s32.totalorder %s1849_s2, %s1849_s2 }
  0x51   :  { %p1856_p10 = por %p1855_p9, %p1854_p8 }
  0x53   :  { %p1857_p11 = pnand %p1856_p10, %p1850_p7 }
  0x55   :  { %1860 = shalt.err (!%p1857_p11)
}
  0x56   :  { %80 = dma.hbm_to_vmem [thread:$0]  %s2335_s4, 256, %s75_s17, [#allocation9], %s1919_s1, %s1919_s1, %s1920_s18  }
  0x57   :  { %s1861_s15 = scalar_lea.hbm %s2337_s6, 512 }
  0x58   :  { %p1862_p12 = scmp.ne.s32.totalorder %s2337_s6, %s1861_s15  ;;  %p1865_p13 = scmp.lt.u32.totalorder %s1861_s15, %s2337_s6 }
  0x5a   :  { %p1867_p0 = pnand %p1865_p13, %p1862_p12 }
  0x5c   :  { %1870 = shalt.err (!%p1867_p0)
}
  0x5d   :  { %s1871_s3 = scalar_lea.vmem %s2065_s21, 512  ;;  %p1876_p2 = scmp.lt.s32.totalorder %s2065_s21, %s2065_s21 }
  0x5e   :  { %p1872_p1 = scmp.ne.s32.totalorder %s2065_s21, %s1871_s3  ;;  %p1877_p3 = scmp.lt.s32.totalorder %s1871_s3, %s1871_s3 }
  0x60   :  { %p1878_p4 = por %p1877_p3, %p1876_p2 }
  0x62   :  { %p1879_p5 = pnand %p1878_p4, %p1872_p1 }
  0x64   :  { %1882 = shalt.err (!%p1879_p5)
}
  0x65   :  { %94 = dma.hbm_to_vmem [thread:$0]  %s2337_s6, 512, %s2065_s21, [#allocation12], %s1919_s1, %s1919_s1, %s1920_s18  }
  0x66   :  { %1905 = dma.done.wait [#allocation3], 256  }
  0x67   :  { %1906 = vsyncadd [#allocation3], 4294967040 }
  0x68   :  { %1907 = dma.done.wait [#allocation6], 512  }
  0x69   :  { %1908 = vsyncadd [#allocation6], 4294966784 }
  0x6a   :  { %1909 = dma.done.wait [#allocation9], 512  }
  0x6b   :  { %1910 = vsyncadd [#allocation9], 4294966784 }
  0x6c   :  { %1911 = dma.done.wait [#allocation12], 512  }
  0x6d   :  { %1912 = vsyncadd [#allocation12], 4294966784  ;;  %v1925_v0 = vmov 0.0   ;;  %vm1926_vm0 = vmmov 0   ;;  %v1709_v1 = vld [vmem:[#allocation10] sm:$0xff]   ;;  %v1710_v2 = vld [vmem:[#allocation10 + $0x8] sm:$0xff]  }
  0x6e   :  { %1557 = vmatprep.subr.bf16.mxu1 %v1925_v0  ;;  %1549 = vmatprep.subr.bf16.mxu0 %v1925_v0  ;;  %v1711_v3 = vld [vmem:[#allocation8] sm:$0xff]   ;;  %v125_v5 = vld [vmem:[#allocation5 + $0x8] sm:$0xff]  ;;  %v122_v7 = vld [vmem:[#allocation2] sm:$0xff]  ;;  %vm152_vm1 = vcmask 261120   ;;  %vm345_vm2 = vcmask 130048   ;;  %s1927_s24 = smov 112  }
  0x6f   :  { %1561 = vmatprep.mubr.msk.bf16.mxu1 %vm1926_vm0, %v1925_v0  ;;  %1553 = vmatprep.mubr.msk.bf16.mxu0 %vm1926_vm0, %v1925_v0  ;;  %v124_v4 = vld [vmem:[#allocation5] sm:$0xff]  ;;  %v1712_v6 = vld [vmem:[#allocation8 + $0x8] sm:$0xff]   ;;  %v123_v9 = vld [vmem:[#allocation2 + $0x8] sm:$0xff]  ;;  %vm464_vm3 = vcmask 1043456   ;;  %vm438_vm4 = vcmask 64512   ;;  %s1929_s25 = smov 80  }
  0x70   :  { %1558 = vmatpush3.bf16.msra.mxu1 %v1709_v1  ;;  %1550 = vmatpush3.bf16.msra.mxu0 %v1711_v3  ;;  %v201_v8 = vpack.c.bf16 %v125_v5, %v124_v4  ;;  %v132_v10 = vpack.c.bf16 %v123_v9, %v122_v7  ;;  %v1713_v11 = vld [vmem:[%s2336_s5] sm:$0xff]   ;;  %v1714_v12 = vld [vmem:[%s2336_s5 + $0x8] sm:$0xff]   ;;  %s1930_s12 = smov [#allocation13]  }
  0x71   :  { %1559 = vmatprep.subr.bf16.mxu1 %v1925_v0  ;;  %1551 = vmatprep.subr.bf16.mxu0 %v1925_v0  ;;  %v126_v13 = vld [vmem:[#allocation7] sm:$0xff]  ;;  %v127_v14 = vld [vmem:[#allocation7 + $0x8] sm:$0xff]  ;;  %s1448_s28 = sshll.u32 %s1930_s12, 4  ;;  %s1449_s28 = int_to_ptr.vmem [resolvable:$true] %s1448_s28 }
  0x72   :  { %v269_v15 = vpack.c.bf16 %v127_v14, %v126_v13  ;;  %v1467_v16 = vld [vmem:[%s2339_s8] ss:$0 sm:$0xff]  ;;  %s1883_s13 = scalar_lea.vmem %s1449_s28, 256  ;;  %p1888_p7 = scmp.lt.s32.totalorder %s1449_s28, %s1449_s28 }
  0x73   :  { %v1463_v21 = vld [vmem:[%s2338_s7] ss:$0 sm:$0xff]  ;;  %p1884_p6 = scmp.ne.s32.totalorder %s1449_s28, %s1883_s13  ;;  %p1889_p8 = scmp.lt.s32.totalorder %s1883_s13, %s1883_s13 }
  0x74   :  { %1560 = vmatpush3.bf16.msra.mxu1 %v1710_v2  ;;  %1552 = vmatpush3.bf16.msra.mxu0 %v1712_v6  ;;  %v1471_v36 = vld [vmem:[%s2340_s9] ss:$0 sm:$0xff]  ;;  %s1928_s9 = smov 96  }
  0x75   :  { %1573 = vmatprep.subr.bf16.mxu1 %v1925_v0  ;;  %1565 = vmatprep.subr.bf16.mxu0 %v1925_v0  ;;  %p1890_p9 = por %p1889_p8, %p1888_p7 }
  0x77   :  { %1562 = vmatmul.mubr.msk.bf16.vlgmr.msra.gmra.mrb[0].mxu1 %vm152_vm1, %v201_v8  ;;  %1554 = vmatmul.mubr.msk.bf16.vlgmr.msra.gmra.mrb[0].mxu0 %vm152_vm1, %v132_v10  ;;  %p1891_p10 = pnand %p1890_p9, %p1884_p6 }
  0x78   :  { %1575 = vmatprep.mubr.msk.bf16.mxu1 %vm1926_vm0, %v1925_v0  ;;  %1566 = vmatpush3.bf16.msra.mxu0 %v1713_v11 }
  0x79   :  { %1569 = vmatprep.mubr.msk.bf16.mxu0 %vm1926_vm0, %v1925_v0  ;;  %1567 = vmatprep.subr.bf16.mxu0 %v1925_v0 }
  0x7c   :  { %1568 = vmatpush3.bf16.msra.mxu0 %v1714_v12 }
  0x7d   :  { %1579 = vmatprep.subr.bf16.mxu0 %v1925_v0 }
  0x7f   :  { %1570 = vmatmul.mubr.msk.bf16.vlgmr.msra.gmra.mrb[4].mxu0 %vm152_vm1, %v269_v15 }
  0x80   :  { %1581 = vmatprep.mubr.msk.bf16.mxu0 %vm1926_vm0, %v1925_v0 }
 0x14a   :  { %v258_v17 = vpop.f32.mrb[0].mxu1  ;;  %v190_v22 = vpop.f32.mrb[0].mxu0 }
 0x14b   :  { %v259_v18 = vadd.f32 %v1467_v16, %v258_v17  ;;  %v1563_v19 = vpop.f32.mrb[1].mxu1  ;;  %v1555_v26 = vpop.f32.mrb[1].mxu0  ;;  %v191_v29 = vadd.f32 %v1463_v21, %v190_v22 }
 0x14c   :  { %v261_v20 = vpop.f32.mrb[2].mxu1  ;;  %v193_v27 = vpop.f32.mrb[2].mxu0 }
 0x14d   :  { %v2135_v23 = vpack.c.bf16 %v259_v18, %v259_v18  ;;  %v262_v24 = vadd.f32 %v1467_v16, %v261_v20  ;;  %v1564_v25 = vpop.f32.mrb[3].mxu1  ;;  %v194_v31 = vadd.f32 %v1463_v21, %v193_v27  ;;  %v1556_v32 = vpop.f32.mrb[3].mxu0  ;;  %v2146_v34 = vpack.c.bf16 %v191_v29, %v191_v29 }
 0x14f   :  { %v2137_v28 = vpack.c.bf16 %v262_v24, %v262_v24  ;;  %563 = vrot.lane.b32.xlu1 %v2135_v23, %s1927_s24  ;;  %v350_v30 = vsel %vm345_vm2, %v2135_v23, 0  ;;  %v2148_v35 = vpack.c.bf16 %v194_v31, %v194_v31 }
 0x150   :  { %1574 = vmatpush3.bf16.xpose.msra.mxu1 %v350_v30 }
 0x151   :  { %v396_v33 = vsel %vm345_vm2, %v2137_v28, 0  ;;  %1585 = vmatprep.subr.bf16.mxu1 %v1925_v0 }
 0x152   :  { %1580 = vmatpush3.bf16.xpose.msra.mxu0 %v396_v33  ;;  %v326_v37 = vpop.f32.mrb[4].mxu0 }
 0x153   :  { %615 = vrot.lane.b32.xlu1 %v2137_v28, %s1927_s24  ;;  %1591 = vmatprep.subr.bf16.mxu0 %v1925_v0  ;;  %v327_v38 = vadd.f32 %v1471_v36, %v326_v37  ;;  %v1571_v39 = vpop.f32.mrb[5].mxu0 }
 0x154   :  { %v329_v40 = vpop.f32.mrb[6].mxu0 }
 0x155   :  { %v330_v41 = vadd.f32 %v1471_v36, %v329_v40  ;;  %v1572_v42 = vpop.f32.mrb[7].mxu0  ;;  %v2166_v43 = vpack.c.bf16 %v327_v38, %v327_v38 }
 0x157   :  { %1576 = vmatmul.mubr.msk.bf16.vlgmr.msra.gmra.mrb[4].mxu1 %vm345_vm2, %v2146_v34  ;;  %612 = vrot.lane.b32.xlu1 %v2148_v35, %s1927_s24  ;;  %v2168_v44 = vpack.c.bf16 %v330_v41, %v330_v41  ;;  %v466_v45 = vsel %vm464_vm3, %v2166_v43, 0 }
 0x158   :  { %1587 = vmatprep.mubr.msk.bf16.mxu1 %vm1926_vm0, %v1925_v0  ;;  %1586 = vmatpush3.bf16.msra.mxu1 %v466_v45 }
 0x159   :  { %1582 = vmatmul.mubr.msk.bf16.vlgmr.msra.gmra.mrb[8].mxu0 %vm345_vm2, %v2148_v35  ;;  %v512_v46 = vsel %vm464_vm3, %v2168_v44, 0  ;;  %1597 = vmatprep.subr.bf16.mxu1 %v1925_v0 }
 0x15a   :  { %1593 = vmatprep.mubr.msk.bf16.mxu0 %vm1926_vm0, %v1925_v0  ;;  %1592 = vmatpush3.bf16.msra.mxu0 %v512_v46 }
 0x15b   :  { %1603 = vmatprep.subr.bf16.mxu0 %v1925_v0 }
 0x1c1   :  { %v564_v63 = vpop.permute.xlu1 %563 }
 0x1c2   :  { %v569_v3 = vsel %vm345_vm2, %v564_v63, 0 }
 0x1c5   :  { %v616_v5 = vpop.permute.xlu1 %615 }
 0x1c6   :  { %v621_v7 = vsel %vm345_vm2, %v616_v5, 0 }
 0x1c9   :  { %v613_v9 = vpop.permute.xlu1 %612 }
 0x22a   :  { %v386_v47 = vpop.f32.mrb[4].mxu1 }
 0x22b   :  { %v1577_v48 = vpop.f32.mrb[5].mxu1  ;;  %v439_v49 = vsel %vm438_vm4, %v386_v47, -inf }
 0x22c   :  { %440 = vmax.xlane.f32.xlu0 %v439_v49  ;;  %v389_v50 = vpop.f32.mrb[6].mxu1  ;;  %v432_v51 = vpop.f32.mrb[8].mxu0 }
 0x22d   :  { %v1578_v52 = vpop.f32.mrb[7].mxu1  ;;  %v1583_v53 = vpop.f32.mrb[9].mxu0  ;;  %v442_v56 = vsel %vm438_vm4, %v432_v51, -inf  ;;  %v1715_v50 = vld [vmem:[#allocation11] sm:$0xff]  }
 0x22e   :  { %v435_v54 = vpop.f32.mrb[10].mxu0 }
 0x22f   :  { %v1584_v55 = vpop.f32.mrb[11].mxu0 }
 0x230   :  { %443 = vmax.xlane.f32.xlu0 %v442_v56 }
 0x246   :  { %560 = vrot.lane.b32.xlu0 %v2146_v34, %s1927_s24 }
 0x2b9   :  { %v441_v57 = vpop.xlane.xlu0 %440 }
 0x2ba   :  { %v445_v58 = vsub.f32 %v386_v47, %v441_v57 }
 0x2bc   :  { %v447_v59 = vmul.f32 1.442695, %v445_v58 }
 0x2bd   :  { %v444_v60 = vpop.xlane.xlu0 %443 }
 0x2be   :  { %1719 = vpow2.f32 %v447_v59  ;;  %v446_v61 = vsub.f32 %v432_v51, %v444_v60 }
 0x2c0   :  { %v449_v62 = vmul.f32 1.442695, %v446_v61 }
 0x2c1   :  { %v561_v8 = vpop.permute.xlu0 %560 }
 0x2c2   :  { %1721 = vpow2.f32 %v449_v62  ;;  %v1716_v62 = vld [vmem:[#allocation11 + $0x8] sm:$0xff]  }
 0x2c8   :  { %v1720_v1 = vpop.eup %1719 }
 0x2c9   :  { %v457_v2 = vpack.c.bf16 %v1720_v1, %v1720_v1  ;;  %v451_v30 = vsel %vm438_vm4, %v1720_v1, 0.0 }
 0x2cb   :  { %1588 = vmatmul.mubr.msk.bf16.vlgmr.msra.gmra.mrb[8].mxu1 %vm438_vm4, %v457_v2 }
 0x2cc   :  { %v1722_v4 = vpop.eup %1721  ;;  %1598 = vmatpush3.bf16.xpose.msra.mxu1 %v569_v3  ;;  %1599 = vmatprep.mubr.msk.bf16.mxu1 %vm1926_vm0, %v1925_v0 }
 0x2cd   :  { %v458_v6 = vpack.c.bf16 %v1722_v4, %v1722_v4  ;;  %1609 = vmatprep.subr.bf16.mxu1 %v1925_v0  ;;  %v454_v31 = vsel %vm438_vm4, %v1722_v4, 0.0 }
 0x2cf   :  { %1594 = vmatmul.mubr.msk.bf16.vlgmr.msra.gmra.mrb[12].mxu0 %vm438_vm4, %v458_v6 }
 0x2d0   :  { %1604 = vmatpush3.bf16.xpose.msra.mxu0 %v621_v7  ;;  %1605 = vmatprep.mubr.msk.bf16.mxu0 %vm1926_vm0, %v1925_v0 }
 0x2d1   :  { %1615 = vmatprep.subr.bf16.mxu0 %v1925_v0 }
 0x2d3   :  { %1600 = vmatmul.mubr.msk.bf16.vlgmr.msra.gmra.mrb[12].mxu1 %vm345_vm2, %v561_v8 }
 0x2d4   :  { %1611 = vmatprep.mubr.msk.bf16.mxu1 %vm1926_vm0, %v1925_v0 }
 0x2d7   :  { %1606 = vmatmul.mubr.msk.bf16.vlgmr.msra.gmra.mrb[16].mxu0 %vm345_vm2, %v613_v9 }
 0x2d8   :  { %1617 = vmatprep.mubr.msk.bf16.mxu0 %vm1926_vm0, %v1925_v0 }
 0x39e   :  { %v2196_v10 = vpop.f32.mrb[8].mxu1 }
 0x39f   :  { %v1589_v11 = vpop.f32.mrb[9].mxu1 }
 0x3a0   :  { %v505_v12 = vpop.f32.mrb[10].mxu1 }
 0x3a1   :  { %v1590_v13 = vpop.f32.mrb[11].mxu1 }
 0x3a2   :  { %v2198_v14 = vpop.f32.mrb[12].mxu0 }
 0x3a3   :  { %v1595_v15 = vpop.f32.mrb[13].mxu0 }
 0x3a4   :  { %v551_v16 = vpop.f32.mrb[14].mxu0 }
 0x3a5   :  { %v1596_v17 = vpop.f32.mrb[15].mxu0 }
 0x3a6   :  { %v605_v18 = vpop.f32.mrb[12].mxu1 }
 0x3a7   :  { %v1601_v19 = vpop.f32.mrb[13].mxu1  ;;  %v663_v20 = vsel %vm438_vm4, %v605_v18, -inf }
 0x3a8   :  { %664 = vmax.xlane.f32.xlu1 %v663_v20  ;;  %v608_v21 = vpop.f32.mrb[14].mxu1 }
 0x3a9   :  { %v1602_v22 = vpop.f32.mrb[15].mxu1 }
 0x3aa   :  { %v657_v24 = vpop.f32.mrb[16].mxu0 }
 0x3ab   :  { %v1607_v25 = vpop.f32.mrb[17].mxu0  ;;  %v666_v26 = vsel %vm438_vm4, %v657_v24, -inf }
 0x3ac   :  { %667 = vmax.xlane.f32.xlu0 %v666_v26  ;;  %v660_v27 = vpop.f32.mrb[18].mxu0 }
 0x3ad   :  { %v1608_v29 = vpop.f32.mrb[19].mxu0 }
 0x3b9   :  { %684 = vrot.lane.b32.xlu1 %v2166_v43, %s1927_s24 }
 0x3c2   :  { %733 = vrot.lane.b32.xlu0 %v2168_v44, %s1927_s24 }
 0x3dd   :  { %452 = vadd.xlane.f32.xlu1 %v451_v30 }
 0x3e1   :  { %455 = vadd.xlane.f32.xlu0 %v454_v31 }
 0x3ee   :  { %888 = vrot.lane.b32.xlu1 %v2135_v23, %s1928_s9 }
 0x3f7   :  { %938 = vrot.lane.b32.xlu0 %v2137_v28, %s1928_s9 }
 0x435   :  { %v665_v32 = vpop.xlane.xlu1 %664 }
 0x436   :  { %v669_v33 = vsub.f32 %v605_v18, %v665_v32 }
 0x438   :  { %v671_v36 = vmul.f32 1.442695, %v669_v33 }
 0x439   :  { %v685_v37 = vpop.permute.xlu1 %684  ;;  %v668_v38 = vpop.xlane.xlu0 %667 }
 0x43a   :  { %1723 = vpow2.f32 %v671_v36  ;;  %v690_v39 = vsel %vm464_vm3, %v685_v37, 0  ;;  %v670_v40 = vsub.f32 %v657_v24, %v668_v38 }
 0x43b   :  { %1610 = vmatpush3.bf16.msra.mxu1 %v690_v39 }
 0x43c   :  { %v673_v41 = vmul.f32 1.442695, %v670_v40  ;;  %1621 = vmatprep.subr.bf16.mxu1 %v1925_v0 }
 0x43d   :  { %v734_v42 = vpop.permute.xlu0 %733 }
 0x43e   :  { %1725 = vpow2.f32 %v673_v41  ;;  %v739_v45 = vsel %vm464_vm3, %v734_v42, 0 }
 0x43f   :  { %1616 = vmatpush3.bf16.msra.mxu0 %v739_v45 }
 0x440   :  { %1627 = vmatprep.subr.bf16.mxu0 %v1925_v0 }
 0x444   :  { %v1724_v46 = vpop.eup %1723 }
 0x445   :  { %v675_v47 = vsel %vm438_vm4, %v1724_v46, 0.0  ;;  %v681_v48 = vpack.c.bf16 %v1724_v46, %v1724_v46 }
 0x446   :  { %676 = vadd.xlane.f32.xlu1 %v675_v47 }
 0x447   :  { %1612 = vmatmul.mubr.msk.bf16.vlgmr.msra.gmra.mrb[16].mxu1 %vm438_vm4, %v681_v48 }
 0x448   :  { %v1726_v49 = vpop.eup %1725  ;;  %1623 = vmatprep.mubr.msk.bf16.mxu1 %vm1926_vm0, %v1925_v0  ;;  %1622 = vmatpush3.bf16.msra.mxu1 %v1716_v62  ;;  %v1717_v62 = vld [vmem:[#allocation11 + $0x10] sm:$0xff]  }
 0x449   :  { %v678_v51 = vsel %vm438_vm4, %v1726_v49, 0.0  ;;  %v682_v52 = vpack.c.bf16 %v1726_v49, %v1726_v49  ;;  %1633 = vmatprep.subr.bf16.mxu1 %v1925_v0 }
 0x44a   :  { %679 = vadd.xlane.f32.xlu1 %v678_v51 }
 0x44b   :  { %1618 = vmatmul.mubr.msk.bf16.vlgmr.msra.gmra.mrb[20].mxu0 %vm438_vm4, %v682_v52 }
 0x44c   :  { %1628 = vmatpush3.bf16.msra.mxu0 %v1715_v50  ;;  %1629 = vmatprep.mubr.msk.bf16.mxu0 %vm1926_vm0, %v1925_v0 }
 0x44d   :  { %1639 = vmatprep.subr.bf16.mxu0 %v1925_v0 }
 0x45b   :  { %886 = vrot.lane.b32.xlu1 %v2146_v34, %s1928_s9 }
 0x45f   :  { %936 = vrot.lane.b32.xlu1 %v2148_v35, %s1928_s9 }
 0x46a   :  { %v453_v53 = vpop.xlane.xlu1 %452 }
 0x46b   :  { %1727 = vrcp.f32 %v453_v53 }
 0x46e   :  { %v456_v54 = vpop.xlane.xlu0 %455  ;;  %v889_v63 = vpop.permute.xlu1 %888 }
 0x46f   :  { %1729 = vrcp.f32 %v456_v54  ;;  %v894_v18 = vsel %vm345_vm2, %v889_v63, 0 }
 0x472   :  { %v939_v59 = vpop.permute.xlu0 %938 }
 0x473   :  { %v944_v61 = vsel %vm345_vm2, %v939_v59, 0 }
 0x475   :  { %v1728_v55 = vpop.eup %1727 }
 0x476   :  { %v556_v57 = vmul.f32 %v1728_v55, %v2196_v10 }
 0x479   :  { %v1730_v56 = vpop.eup %1729 }
 0x47a   :  { %v557_v58 = vmul.f32 %v1730_v56, %v2198_v14 }
 0x47c   :  { %v558_v60 = vpack.c.bf16 %v557_v58, %v556_v57 }
 0x47e   :  { %1630 = vmatmul.mubr.msk.bf16.vlgmr.msra.gmra.mrb[24].mxu0 %vm345_vm2, %v558_v60 }
 0x47f   :  { %1640 = vmatpush3.bf16.xpose.msra.mxu0 %v944_v61  ;;  %1641 = vmatprep.mubr.msk.bf16.mxu0 %vm1926_vm0, %v1925_v0 }
 0x480   :  { %1651 = vmatprep.subr.bf16.mxu0 %v1925_v0 }
 0x4d3   :  { %v677_v1 = vpop.xlane.xlu1 %676 }
 0x4d4   :  { %1731 = vrcp.f32 %v677_v1 }
 0x4d7   :  { %v680_v2 = vpop.xlane.xlu1 %679 }
 0x4d8   :  { %1733 = vrcp.f32 %v680_v2 }
 0x4db   :  { %v887_v3 = vpop.permute.xlu1 %886 }
 0x4de   :  { %v1732_v5 = vpop.eup %1731 }
 0x4df   :  { %v937_v4 = vpop.permute.xlu1 %936 }
 0x4e0   :  { %1642 = vmatmul.mubr.msk.bf16.vlgmr.msra.gmra.mrb[28].mxu0 %vm345_vm2, %v937_v4 }
 0x4e1   :  { %1653 = vmatprep.mubr.msk.bf16.mxu0 %vm1926_vm0, %v1925_v0 }
 0x4e2   :  { %v1734_v11 = vpop.eup %1733 }
 0x51a   :  { %v726_v6 = vpop.f32.mrb[16].mxu1 }
 0x51b   :  { %v783_v7 = vmul.f32 %v1732_v5, %v726_v6  ;;  %v1613_v8 = vpop.f32.mrb[17].mxu1 }
 0x51c   :  { %v729_v9 = vpop.f32.mrb[18].mxu1 }
 0x51d   :  { %v1614_v10 = vpop.f32.mrb[19].mxu1 }
 0x51e   :  { %v775_v12 = vpop.f32.mrb[20].mxu0 }
 0x51f   :  { %v784_v13 = vmul.f32 %v1734_v11, %v775_v12  ;;  %v1619_v14 = vpop.f32.mrb[21].mxu0 }
 0x520   :  { %v778_v15 = vpop.f32.mrb[22].mxu0 }
 0x521   :  { %v785_v16 = vpack.c.bf16 %v784_v13, %v783_v7  ;;  %v1620_v17 = vpop.f32.mrb[23].mxu0 }
 0x523   :  { %1624 = vmatmul.mubr.msk.bf16.vlgmr.msra.gmra.mrb[20].mxu1 %vm345_vm2, %v785_v16 }
 0x524   :  { %1634 = vmatpush3.bf16.xpose.msra.mxu1 %v894_v18  ;;  %1635 = vmatprep.mubr.msk.bf16.mxu1 %vm1926_vm0, %v1925_v0 }
 0x525   :  { %1645 = vmatprep.subr.bf16.mxu1 %v1925_v0 }
 0x52b   :  { %1636 = vmatmul.mubr.msk.bf16.vlgmr.msra.gmra.mrb[24].mxu1 %vm345_vm2, %v887_v3 }
 0x52c   :  { %1647 = vmatprep.mubr.msk.bf16.mxu1 %vm1926_vm0, %v1925_v0 }
 0x551   :  { %v879_v19 = vpop.f32.mrb[24].mxu0 }
 0x552   :  { %v1631_v20 = vpop.f32.mrb[25].mxu0 }
 0x553   :  { %v882_v21 = vpop.f32.mrb[26].mxu0 }
 0x554   :  { %v1632_v22 = vpop.f32.mrb[27].mxu0 }
 0x5b3   :  { %v980_v24 = vpop.f32.mrb[28].mxu0 }
 0x5b4   :  { %v1643_v25 = vpop.f32.mrb[29].mxu0  ;;  %v989_v26 = vsel %vm438_vm4, %v980_v24, -inf }
 0x5b5   :  { %990 = vmax.xlane.f32.xlu0 %v989_v26  ;;  %v983_v27 = vpop.f32.mrb[30].mxu0 }
 0x5b6   :  { %v1644_v29 = vpop.f32.mrb[31].mxu0 }
 0x5cb   :  { %1006 = vrot.lane.b32.xlu0 %v2166_v43, %s1928_s9 }
 0x5f6   :  { %v829_v30 = vpop.f32.mrb[20].mxu1 }
 0x5f7   :  { %v2251_v31 = vadd.f32 %v879_v19, %v829_v30  ;;  %v1625_v32 = vpop.f32.mrb[21].mxu1 }
 0x5f8   :  { %v832_v33 = vpop.f32.mrb[22].mxu1 }
 0x5f9   :  { %v2253_v36 = vadd.f32 %v882_v21, %v832_v33  ;;  %v1626_v37 = vpop.f32.mrb[23].mxu1 }
 0x5fe   :  { %v930_v38 = vpop.f32.mrb[24].mxu1 }
 0x5ff   :  { %v1637_v39 = vpop.f32.mrb[25].mxu1  ;;  %v986_v40 = vsel %vm438_vm4, %v930_v38, -inf }
 0x600   :  { %987 = vmax.xlane.f32.xlu1 %v986_v40  ;;  %v933_v41 = vpop.f32.mrb[26].mxu1 }
 0x601   :  { %v1638_v42 = vpop.f32.mrb[27].mxu1 }
 0x611   :  { %1054 = vrot.lane.b32.xlu1 %v2168_v44, %s1928_s9 }
 0x642   :  { %v991_v45 = vpop.xlane.xlu0 %990 }
 0x643   :  { %v993_v46 = vsub.f32 %v980_v24, %v991_v45 }
 0x645   :  { %v996_v47 = vmul.f32 1.442695, %v993_v46 }
 0x646   :  { %v1007_v48 = vpop.permute.xlu0 %1006 }
 0x647   :  { %1735 = vpow2.f32 %v996_v47  ;;  %v1012_v49 = vsel %vm464_vm3, %v1007_v48, 0 }
 0x648   :  { %1646 = vmatpush3.bf16.msra.mxu1 %v1012_v49 }
 0x649   :  { %1657 = vmatprep.subr.bf16.mxu1 %v1925_v0 }
 0x651   :  { %v1736_v50 = vpop.eup %1735 }
 0x652   :  { %v1001_v51 = vsel %vm438_vm4, %v1736_v50, 0.0  ;;  %v1005_v57 = vpack.c.bf16 %v1736_v50, %v1736_v50 }
 0x653   :  { %1002 = vadd.xlane.f32.xlu0 %v1001_v51 }
 0x669   :  { %1161 = vrot.lane.b32.xlu0 %v2135_v23, %s1929_s25 }
 0x66d   :  { %1209 = vrot.lane.b32.xlu0 %v2148_v35, %s1929_s25 }
 0x68d   :  { %v988_v52 = vpop.xlane.xlu1 %987 }
 0x68e   :  { %v992_v53 = vsub.f32 %v930_v38, %v988_v52  ;;  %v1718_v52 = vld [vmem:[#allocation11 + $0x18] sm:$0xff]  }
 0x690   :  { %v994_v54 = vmul.f32 1.442695, %v992_v53 }
 0x691   :  { %v1055_v55 = vpop.permute.xlu1 %1054 }
 0x692   :  { %1737 = vpow2.f32 %v994_v54  ;;  %v1060_v56 = vsel %vm464_vm3, %v1055_v55, 0 }
 0x693   :  { %1652 = vmatpush3.bf16.msra.mxu0 %v1060_v56 }
 0x694   :  { %1663 = vmatprep.subr.bf16.mxu0 %v1925_v0 }
 0x696   :  { %1654 = vmatmul.mubr.msk.bf16.vlgmr.msra.gmra.mrb[32].mxu0 %vm438_vm4, %v1005_v57 }
 0x697   :  { %1665 = vmatprep.mubr.msk.bf16.mxu0 %vm1926_vm0, %v1925_v0 }
 0x69c   :  { %v1738_v23 = vpop.eup %1737 }
 0x69d   :  { %v998_v58 = vsel %vm438_vm4, %v1738_v23, 0.0  ;;  %v1004_v35 = vpack.c.bf16 %v1738_v23, %v1738_v23 }
 0x69e   :  { %999 = vadd.xlane.f32.xlu1 %v998_v58 }
 0x69f   :  { %1648 = vmatmul.mubr.msk.bf16.vlgmr.msra.gmra.mrb[28].mxu1 %vm438_vm4, %v1004_v35 }
 0x6a0   :  { %1659 = vmatprep.mubr.msk.bf16.mxu1 %vm1926_vm0, %v1925_v0  ;;  %1658 = vmatpush3.bf16.msra.mxu1 %v1717_v62 }
 0x6a1   :  { %1669 = vmatprep.subr.bf16.mxu1 %v1925_v0 }
 0x6af   :  { %1211 = vrot.lane.b32.xlu1 %v2137_v28, %s1929_s25 }
 0x6b3   :  { %1159 = vrot.lane.b32.xlu1 %v2146_v34, %s1929_s25 }
 0x6e0   :  { %v1003_v59 = vpop.xlane.xlu0 %1002 }
 0x6e1   :  { %1739 = vrcp.f32 %v1003_v59 }
 0x6e4   :  { %v1162_v60 = vpop.permute.xlu0 %1161 }
 0x6e5   :  { %v1167_v61 = vsel %vm345_vm2, %v1162_v60, 0 }
 0x6e6   :  { %1664 = vmatpush3.bf16.xpose.msra.mxu0 %v1167_v61 }
 0x6e7   :  { %1675 = vmatprep.subr.bf16.mxu0 %v1925_v0 }
 0x6e8   :  { %v1210_v15 = vpop.permute.xlu0 %1209 }
 0x6eb   :  { %v1740_v28 = vpop.eup %1739 }
 0x72b   :  { %v1000_v63 = vpop.xlane.xlu1 %999 }
 0x72c   :  { %1741 = vrcp.f32 %v1000_v63 }
 0x72f   :  { %v1212_v1 = vpop.permute.xlu1 %1211 }
 0x730   :  { %v1217_v14 = vsel %vm345_vm2, %v1212_v1, 0 }
 0x733   :  { %v1160_v2 = vpop.permute.xlu1 %1159 }
 0x734   :  { %1666 = vmatmul.mubr.msk.bf16.vlgmr.msra.gmra.mrb[36].mxu0 %vm345_vm2, %v1160_v2 }
 0x735   :  { %1677 = vmatprep.mubr.msk.bf16.mxu0 %vm1926_vm0, %v1925_v0 }
 0x736   :  { %v1742_v7 = vpop.eup %1741 }
 0x769   :  { %v1096_v34 = vpop.f32.mrb[32].mxu0 }
 0x76a   :  { %v1105_v3 = vmul.f32 %v1740_v28, %v1096_v34  ;;  %v1655_v4 = vpop.f32.mrb[33].mxu0  ;;  %v1499_v28 = vld [vmem:[%s2341_s10] ss:$0 sm:$0xff] }
 0x76b   :  { %v1099_v5 = vpop.f32.mrb[34].mxu0 }
 0x76c   :  { %v1656_v6 = vpop.f32.mrb[35].mxu0 }
 0x772   :  { %v1048_v8 = vpop.f32.mrb[28].mxu1 }
 0x773   :  { %v1104_v9 = vmul.f32 %v1742_v7, %v1048_v8  ;;  %v1649_v10 = vpop.f32.mrb[29].mxu1 }
 0x774   :  { %v1051_v11 = vpop.f32.mrb[30].mxu1 }
 0x775   :  { %v1106_v12 = vpack.c.bf16 %v1105_v3, %v1104_v9  ;;  %v1650_v13 = vpop.f32.mrb[31].mxu1 }
 0x777   :  { %1660 = vmatmul.mubr.msk.bf16.vlgmr.msra.gmra.mrb[32].mxu1 %vm345_vm2, %v1106_v12 }
 0x778   :  { %1670 = vmatpush3.bf16.xpose.msra.mxu1 %v1217_v14  ;;  %1671 = vmatprep.mubr.msk.bf16.mxu1 %vm1926_vm0, %v1925_v0 }
 0x779   :  { %1681 = vmatprep.subr.bf16.mxu1 %v1925_v0 }
 0x77f   :  { %1672 = vmatmul.mubr.msk.bf16.vlgmr.msra.gmra.mrb[36].mxu1 %vm345_vm2, %v1210_v15 }
 0x780   :  { %1683 = vmatprep.mubr.msk.bf16.mxu1 %vm1926_vm0, %v1925_v0 }
 0x807   :  { %v1203_v16 = vpop.f32.mrb[36].mxu0 }
 0x808   :  { %v1667_v17 = vpop.f32.mrb[37].mxu0  ;;  %v1259_v18 = vsel %vm438_vm4, %v1203_v16, -inf }
 0x809   :  { %1260 = vmax.xlane.f32.xlu1 %v1259_v18  ;;  %v1206_v19 = vpop.f32.mrb[38].mxu0 }
 0x80a   :  { %v1668_v20 = vpop.f32.mrb[39].mxu0 }
 0x81a   :  { %1327 = vrot.lane.b32.xlu1 %v2168_v44, %s1929_s25 }
 0x84a   :  { %v1150_v21 = vpop.f32.mrb[32].mxu1 }
 0x84b   :  { %v1157_v22 = vadd.f32 %v1150_v21, %v2251_v31  ;;  %v1661_v24 = vpop.f32.mrb[33].mxu1 }
 0x84c   :  { %v1153_v25 = vpop.f32.mrb[34].mxu1 }
 0x84d   :  { %v2297_v26 = vadd.f32 %v1153_v25, %v2253_v36  ;;  %v1662_v27 = vpop.f32.mrb[35].mxu1 }
 0x852   :  { %v1253_v29 = vpop.f32.mrb[36].mxu1 }
 0x853   :  { %v1673_v30 = vpop.f32.mrb[37].mxu1  ;;  %v1262_v32 = vsel %vm438_vm4, %v1253_v29, -inf }
 0x854   :  { %1263 = vmax.xlane.f32.xlu0 %v1262_v32  ;;  %v1256_v33 = vpop.f32.mrb[38].mxu1 }
 0x855   :  { %v1674_v37 = vpop.f32.mrb[39].mxu1 }
 0x86a   :  { %1279 = vrot.lane.b32.xlu0 %v2166_v43, %s1929_s25 }
 0x896   :  { %v1261_v44 = vpop.xlane.xlu1 %1260 }
 0x897   :  { %v1265_v38 = vsub.f32 %v1203_v16, %v1261_v44 }
 0x899   :  { %v1267_v39 = vmul.f32 1.442695, %v1265_v38 }
 0x89a   :  { %v1328_v31 = vpop.permute.xlu1 %1327 }
 0x89b   :  { %1743 = vpow2.f32 %v1267_v39  ;;  %v1333_v40 = vsel %vm464_vm3, %v1328_v31, 0 }
 0x89c   :  { %1682 = vmatpush3.bf16.msra.mxu1 %v1333_v40 }
 0x8a5   :  { %v1744_v36 = vpop.eup %1743 }
 0x8a6   :  { %v1271_v41 = vsel %vm438_vm4, %v1744_v36, 0.0  ;;  %v1277_v43 = vpack.c.bf16 %v1744_v36, %v1744_v36 }
 0x8a7   :  { %1272 = vadd.xlane.f32.xlu1 %v1271_v41 }
 0x8e1   :  { %v1264_v42 = vpop.xlane.xlu0 %1263 }
 0x8e2   :  { %v1266_v45 = vsub.f32 %v1253_v29, %v1264_v42 }
 0x8e4   :  { %v1269_v46 = vmul.f32 1.442695, %v1266_v45 }
 0x8e5   :  { %v1280_v47 = vpop.permute.xlu0 %1279 }
 0x8e6   :  { %1745 = vpow2.f32 %v1269_v46  ;;  %v1285_v48 = vsel %vm464_vm3, %v1280_v47, 0 }
 0x8e7   :  { %1676 = vmatpush3.bf16.msra.mxu0 %v1285_v48 }
 0x8e8   :  { %1687 = vmatprep.subr.bf16.mxu0 %v1925_v0 }
 0x8ea   :  { %1678 = vmatmul.mubr.msk.bf16.vlgmr.msra.gmra.mrb[40].mxu0 %vm438_vm4, %v1277_v43 }
 0x8eb   :  { %1689 = vmatprep.mubr.msk.bf16.mxu0 %vm1926_vm0, %v1925_v0  ;;  %1688 = vmatpush3.bf16.msra.mxu0 %v1718_v52 }
 0x8f0   :  { %v1746_v49 = vpop.eup %1745 }
 0x8f1   :  { %v1274_v50 = vsel %vm438_vm4, %v1746_v49, 0.0  ;;  %v1278_v51 = vpack.c.bf16 %v1746_v49, %v1746_v49 }
 0x8f2   :  { %1275 = vadd.xlane.f32.xlu0 %v1274_v50 }
 0x8f3   :  { %1684 = vmatmul.mubr.msk.bf16.vlgmr.msra.gmra.mrb[40].mxu1 %vm438_vm4, %v1278_v51 }
 0x934   :  { %v1273_v53 = vpop.xlane.xlu1 %1272 }
 0x935   :  { %1747 = vrcp.f32 %v1273_v53 }
 0x93f   :  { %v1748_v58 = vpop.eup %1747 }
 0x97f   :  { %v1276_v54 = vpop.xlane.xlu0 %1275 }
 0x980   :  { %1749 = vrcp.f32 %v1276_v54 }
 0x98a   :  { %v1750_v35 = vpop.eup %1749 }
 0x9bd   :  { %v1321_v55 = vpop.f32.mrb[40].mxu0 }
 0x9be   :  { %v1679_v56 = vpop.f32.mrb[41].mxu0  ;;  %v1377_v59 = vmul.f32 %v1748_v58, %v1321_v55 }
 0x9bf   :  { %v1324_v57 = vpop.f32.mrb[42].mxu0 }
 0x9c0   :  { %v1680_v23 = vpop.f32.mrb[43].mxu0 }
 0x9c6   :  { %v1369_v0 = vpop.f32.mrb[40].mxu1 }
 0x9c7   :  { %v1378_v60 = vmul.f32 %v1750_v35, %v1369_v0  ;;  %v1685_v61 = vpop.f32.mrb[41].mxu1 }
 0x9c8   :  { %v1372_v62 = vpop.f32.mrb[42].mxu1 }
 0x9c9   :  { %v1379_v63 = vpack.c.bf16 %v1378_v60, %v1377_v59  ;;  %v1686_v1 = vpop.f32.mrb[43].mxu1 }
 0x9cb   :  { %1690 = vmatmul.mubr.msk.bf16.vlgmr.msra.gmra.mrb[44].mxu0 %vm345_vm2, %v1379_v63 }
 0xa9e   :  { %v1423_v2 = vpop.f32.mrb[44].mxu0 }
 0xa9f   :  { %v1430_v34 = vadd.f32 %v1423_v2, %v1157_v22  ;;  %v1691_v3 = vpop.f32.mrb[45].mxu0 }
 0xaa0   :  { %v1426_v4 = vpop.f32.mrb[46].mxu0 }
 0xaa1   :  { %v1439_v5 = vadd.f32 %v1499_v28, %v1430_v34  ;;  %v1431_v6 = vadd.f32 %v1426_v4, %v2297_v26  ;;  %v1692_v7 = vpop.f32.mrb[47].mxu0 }
 0xaa3   :  { %1441 = vst [vmem:[#allocation13] sm:$0xff] %v1439_v5  ;;  %v1440_v8 = vadd.f32 %v1499_v28, %v1431_v6 }
 0xaa5   :  { %1442 = vst [vmem:[#allocation13 + $0x8] sm:$0xff] %v1440_v8 }
 0xaa6   :  { %1894 = shalt.err (!%p1891_p10)
}
 0xaa7   :  { %s1895_s15 = scalar_lea.hbm %s2342_s11, 256 }
 0xaa8   :  { %p1896_p11 = scmp.ne.s32.totalorder %s2342_s11, %s1895_s15  ;;  %p1899_p12 = scmp.lt.u32.totalorder %s1895_s15, %s2342_s11 }
 0xaaa   :  { %p1901_p13 = pnand %p1899_p12, %p1896_p11 }
 0xaac   :  { %1904 = shalt.err (!%p1901_p13)
}
 0xaad   :  { %1454 = dma.vmem_to_hbm [thread:$0]  %s1449_s28, 256, %s2342_s11, [#allocation4], %s1917_s29, %s1917_s29, %s1918_s30  }
 0xaae   :  { %1913 = dma.done.wait [#allocation4], 256  }
 0xaaf   :  { %1914 = vsyncadd [#allocation4], 4294967040 }
 0xab0   :  { %1458 = vsyncpa [#allocation3], 1 }
 0xab1   :  { %1459 = vsyncpa [#allocation6], 1 }
 0xab2   :  { %1460 = vsyncpa [#allocation9], 1 }
 0xab3   :  { %1461 = vsyncpa [#allocation12], 1 }
 0xab4   :  { %1462 = vsyncpa [#allocation4], 1 }

</bundles_post_ra>
